<compile_context>
chip_gen: v7x
topology: tpu7x:2x2x1
jax: 0.10.0
libtpu: 0.0.40
codegen_flags: <defaults>
</compile_context>

<pallas_src>
import jax
import jax.numpy as jnp
from jax.experimental import pallas as pl
from jax.experimental.pallas import tpu as pltpu


def _ffn_kernel(x_ref, w1_ref, b1_ref, w2_ref, b2_ref, o_ref, acc_ref):
    j = pl.program_id(1)

    @pl.when(j == 0)
    def _():
        acc_ref[...] = jnp.zeros_like(acc_ref)

    # First linear on this d_ff slice: (TM, d_model) @ (d_model, TF), f32 acc.
    h = jnp.dot(x_ref[...], w1_ref[...], preferred_element_type=jnp.float32)
    h = h + b1_ref[...].astype(jnp.float32)
    h = jnp.maximum(h, 0.0)  # ReLU (in f32 on the VPU)
    # TODO(synk): dropout implemented as identity (eval mode); training-mode
    # dropout would use pltpu.prng_seed + pltpu.stateful_bernoulli here.

    # Second linear partial product for this d_ff slice, accumulated in f32.
    acc_ref[...] += jnp.dot(h.astype(w2_ref.dtype), w2_ref[...],
                            preferred_element_type=jnp.float32)

    @pl.when(j == pl.num_programs(1) - 1)
    def _():
        o_ref[...] = (acc_ref[...]
                      + b2_ref[...].astype(jnp.float32)).astype(o_ref.dtype)


def positionwise_feed_forward(x, w1, b1, w2, b2, *, row_tile=256, ff_tile=512):
    """Forward pass of PositionwiseFeedForward: relu(x @ W1 + b1) @ W2 + b2.

    x:  (..., d_model)
    w1: (d_model, d_ff)   (transposed vs torch nn.Linear weight layout)
    b1: (d_ff,)
    w2: (d_ff, d_model)
    b2: (d_model,)
    """
    orig_shape = x.shape
    d_model = orig_shape[-1]
    d_ff = w1.shape[1]
    assert w1.shape == (d_model, d_ff)
    assert w2.shape == (d_ff, d_model)
    assert b1.shape == (d_ff,) and b2.shape == (d_model,)

    x2d = x.reshape(-1, d_model)
    n_rows = x2d.shape[0]

    # Row tiling: big tiles for MXU utilization; pad rows so tiles divide.
    sublane = 16 if x.dtype == jnp.bfloat16 else 8
    tm = min(row_tile, pl.cdiv(n_rows, sublane) * sublane)
    tm = max(tm, sublane)
    padded_rows = pl.cdiv(n_rows, tm) * tm
    if padded_rows != n_rows:
        x2d = jnp.pad(x2d, ((0, padded_rows - n_rows), (0, 0)))

    # d_ff tiling: zero-pad hidden dim so tiles divide evenly (padded hidden
    # units contribute exactly 0 to the accumulator).
    tf = min(ff_tile, d_ff)
    padded_ff = pl.cdiv(d_ff, tf) * tf
    if padded_ff != d_ff:
        pad_ff = padded_ff - d_ff
        w1 = jnp.pad(w1, ((0, 0), (0, pad_ff)))
        b1 = jnp.pad(b1, (0, pad_ff))
        w2 = jnp.pad(w2, ((0, pad_ff), (0, 0)))

    b1_2d = b1.reshape(1, padded_ff)
    b2_2d = b2.reshape(1, d_model)

    grid = (padded_rows // tm, padded_ff // tf)

    out = pl.pallas_call(
        _ffn_kernel,
        out_shape=jax.ShapeDtypeStruct((padded_rows, d_model), x.dtype),
        grid_spec=pltpu.PrefetchScalarGridSpec(
            num_scalar_prefetch=0,
            grid=grid,
            in_specs=[
                pl.BlockSpec((tm, d_model), lambda i, j: (i, 0)),   # x rows
                pl.BlockSpec((d_model, tf), lambda i, j: (0, j)),   # W1 slice
                pl.BlockSpec((1, tf), lambda i, j: (0, j)),         # b1 slice
                pl.BlockSpec((tf, d_model), lambda i, j: (j, 0)),   # W2 slice
                pl.BlockSpec((1, d_model), lambda i, j: (0, 0)),    # b2
            ],
            out_specs=pl.BlockSpec((tm, d_model), lambda i, j: (i, 0)),
            scratch_shapes=[pltpu.VMEM((tm, d_model), jnp.float32)],
        ),
        compiler_params=pltpu.CompilerParams(
            dimension_semantics=("parallel", "arbitrary"),
            vmem_limit_bytes=48 * 1024 * 1024,
        ),
    )(x2d, w1, b1_2d, w2, b2_2d)

    if padded_rows != n_rows:
        out = out[:n_rows]
    return out.reshape(*orig_shape[:-1], d_model)


if __name__ == "__main__":
    # Small shapes consistent with the module's forward.
    batch, seq, d_model, d_ff = 2, 8, 32, 128

    key = jax.random.PRNGKey(0)
    kx, kw1, kb1, kw2, kb2 = jax.random.split(key, 5)

    # Deterministic nn.Linear-style init (uniform bound = 1/sqrt(fan_in)).
    bound1 = 1.0 / (d_model ** 0.5)
    bound2 = 1.0 / (d_ff ** 0.5)
    w1 = jax.random.uniform(kw1, (d_model, d_ff), jnp.float32, -bound1, bound1)
    b1 = jax.random.uniform(kb1, (d_ff,), jnp.float32, -bound1, bound1)
    w2 = jax.random.uniform(kw2, (d_ff, d_model), jnp.float32, -bound2, bound2)
    b2 = jax.random.uniform(kb2, (d_model,), jnp.float32, -bound2, bound2)

    x = jax.random.normal(kx, (batch, seq, d_model), jnp.float32)

    out = positionwise_feed_forward(x, w1, b1, w2, b2)
    out = jax.block_until_ready(out)

    # Pure-JAX reference (dropout in eval mode == identity).
    ref = jnp.maximum(x @ w1 + b1, 0.0) @ w2 + b2
    assert out.shape == (batch, seq, d_model)
    assert jnp.allclose(out, ref, atol=1e-5, rtol=1e-5), "mismatch vs reference"

    print("KERNEL_OK")
</pallas_src>

<mosaic_0001>
module attributes {stable_mosaic.version = 11 : i64} {
  func.func @_ffn_kernel(%arg0: i32, %arg1: i32, %arg2: memref<16x32xf32, #tpu.memory_space<vmem>>, %arg3: memref<32x128xf32, #tpu.memory_space<vmem>>, %arg4: memref<1x128xf32, #tpu.memory_space<vmem>>, %arg5: memref<128x32xf32, #tpu.memory_space<vmem>>, %arg6: memref<1x32xf32, #tpu.memory_space<vmem>>, %arg7: memref<16x32xf32, #tpu.memory_space<vmem>>, %arg8: memref<16x32xf32, #tpu.memory_space<vmem>>) attributes {dimension_semantics = [#tpu.dimension_semantics<parallel>, #tpu.dimension_semantics<arbitrary>], iteration_bounds = array<i64: 1, 1>, scalar_prefetch = 0 : i64, scratch_operands = 1 : i64, tpu.core_type = #tpu.core_type<tc>, window_params = [{transform_indices = @transform_0, window_bounds = array<i64: 16, 32>}, {transform_indices = @transform_1, window_bounds = array<i64: 32, 128>}, {transform_indices = @transform_2, window_bounds = array<i64: 1, 128>}, {transform_indices = @transform_3, window_bounds = array<i64: 128, 32>}, {pipeline_mode = #tpu.pipeline_mode<synchronous>, transform_indices = @transform_4, window_bounds = array<i64: 1, 32>}, {transform_indices = @transform_5, window_bounds = array<i64: 16, 32>}]} {
    %c0_i32 = arith.constant 0 : i32
    %0 = arith.cmpi eq, %arg1, %c0_i32 : i32
    %1 = arith.extui %0 : i1 to i32
    %c0_i32_0 = arith.constant 0 : i32
    %2 = arith.cmpi ne, %1, %c0_i32_0 : i32
    scf.if %2 {
      %cst_16 = arith.constant 0.000000e+00 : f32
      %19 = vector.broadcast %cst_16 : f32 to vector<16x32xf32>
      %c0_17 = arith.constant 0 : index
      %c0_18 = arith.constant 0 : index
      %20 = vector.load %arg8[%c0_17, %c0_18] : memref<16x32xf32, #tpu.memory_space<vmem>>, vector<16x32xf32>
      tpu.vector_store %arg8[%c0_17, %c0_18], %19 {strides = array<i32>} : memref<16x32xf32, #tpu.memory_space<vmem>>, vector<16x32xf32>,
    } else {
    }
    %c0 = arith.constant 0 : index
    %c0_1 = arith.constant 0 : index
    %3 = vector.load %arg2[%c0, %c0_1] : memref<16x32xf32, #tpu.memory_space<vmem>>, vector<16x32xf32>
    %c0_2 = arith.constant 0 : index
    %c0_3 = arith.constant 0 : index
    %4 = vector.load %arg3[%c0_2, %c0_3] : memref<32x128xf32, #tpu.memory_space<vmem>>, vector<32x128xf32>
    %cst = arith.constant dense<0.000000e+00> : vector<16x128xf32>
    %5 = tpu.matmul %3, %4, %cst {dimension_numbers = #tpu.dot_dimension_numbers<[1], [0], [0], [1], [0, 0, 1, 1], [], []>} : vector<16x32xf32>, vector<32x128xf32>, vector<16x128xf32> -> vector<16x128xf32>
    %c0_4 = arith.constant 0 : index
    %c0_5 = arith.constant 0 : index
    %6 = vector.load %arg4[%c0_4, %c0_5] : memref<1x128xf32, #tpu.memory_space<vmem>>, vector<1x128xf32>
    %7 = vector.broadcast %6 : vector<1x128xf32> to vector<16x128xf32>
    %8 = arith.addf %5, %7 : vector<16x128xf32>
    %cst_6 = arith.constant 0.000000e+00 : f32
    %9 = vector.broadcast %cst_6 : f32 to vector<16x128xf32>
    %10 = arith.maximumf %8, %9 : vector<16x128xf32>
    %c0_7 = arith.constant 0 : index
    %c0_8 = arith.constant 0 : index
    %11 = vector.load %arg8[%c0_7, %c0_8] : memref<16x32xf32, #tpu.memory_space<vmem>>, vector<16x32xf32>
    %c0_9 = arith.constant 0 : index
    %c0_10 = arith.constant 0 : index
    %12 = vector.load %arg5[%c0_9, %c0_10] : memref<128x32xf32, #tpu.memory_space<vmem>>, vector<128x32xf32>
    %cst_11 = arith.constant dense<0.000000e+00> : vector<16x32xf32>
    %13 = tpu.matmul %10, %12, %cst_11 {dimension_numbers = #tpu.dot_dimension_numbers<[1], [0], [0], [1], [0, 0, 1, 1], [], []>} : vector<16x128xf32>, vector<128x32xf32>, vector<16x32xf32> -> vector<16x32xf32>
    %14 = arith.addf %11, %13 : vector<16x32xf32>
    %c0_12 = arith.constant 0 : index
    %c0_13 = arith.constant 0 : index
    %15 = vector.load %arg8[%c0_12, %c0_13] : memref<16x32xf32, #tpu.memory_space<vmem>>, vector<16x32xf32>
    tpu.vector_store %arg8[%c0_12, %c0_13], %14 {strides = array<i32>} : memref<16x32xf32, #tpu.memory_space<vmem>>, vector<16x32xf32>,
    %c0_i32_14 = arith.constant 0 : i32
    %16 = arith.cmpi eq, %arg1, %c0_i32_14 : i32
    %17 = arith.extui %16 : i1 to i32
    %c0_i32_15 = arith.constant 0 : i32
    %18 = arith.cmpi ne, %17, %c0_i32_15 : i32
    scf.if %18 {
      %c0_16 = arith.constant 0 : index
      %c0_17 = arith.constant 0 : index
      %19 = vector.load %arg8[%c0_16, %c0_17] : memref<16x32xf32, #tpu.memory_space<vmem>>, vector<16x32xf32>
      %c0_18 = arith.constant 0 : index
      %c0_19 = arith.constant 0 : index
      %20 = vector.load %arg6[%c0_18, %c0_19] : memref<1x32xf32, #tpu.memory_space<vmem>>, vector<1x32xf32>
      %21 = vector.broadcast %20 : vector<1x32xf32> to vector<16x32xf32>
      %22 = arith.addf %19, %21 : vector<16x32xf32>
      %c0_20 = arith.constant 0 : index
      %c0_21 = arith.constant 0 : index
      %23 = vector.load %arg7[%c0_20, %c0_21] : memref<16x32xf32, #tpu.memory_space<vmem>>, vector<16x32xf32>
      tpu.vector_store %arg7[%c0_20, %c0_21], %22 {strides = array<i32>} : memref<16x32xf32, #tpu.memory_space<vmem>>, vector<16x32xf32>,
    } else {
    }
    return
  }
  func.func @transform_0(%arg0: i32, %arg1: i32) -> (i32, i32) {
    %c0_i32 = arith.constant 0 : i32
    %c0_i32_0 = arith.constant 0 : i32
    return %arg0, %c0_i32 : i32, i32
  }
  func.func @transform_1(%arg0: i32, %arg1: i32) -> (i32, i32) {
    %c0_i32 = arith.constant 0 : i32
    %c0_i32_0 = arith.constant 0 : i32
    return %c0_i32, %arg1 : i32, i32
  }
  func.func @transform_2(%arg0: i32, %arg1: i32) -> (i32, i32) {
    %c0_i32 = arith.constant 0 : i32
    %c0_i32_0 = arith.constant 0 : i32
    return %c0_i32, %arg1 : i32, i32
  }
  func.func @transform_3(%arg0: i32, %arg1: i32) -> (i32, i32) {
    %c0_i32 = arith.constant 0 : i32
    %c0_i32_0 = arith.constant 0 : i32
    return %arg1, %c0_i32 : i32, i32
  }
  func.func @transform_4(%arg0: i32, %arg1: i32) -> (i32, i32) {
    %c0_i32 = arith.constant 0 : i32
    %c0_i32_0 = arith.constant 0 : i32
    %c0_i32_1 = arith.constant 0 : i32
    return %c0_i32, %c0_i32_0 : i32, i32
  }
  func.func @transform_5(%arg0: i32, %arg1: i32) -> (i32, i32) {
    %c0_i32 = arith.constant 0 : i32
    %c0_i32_0 = arith.constant 0 : i32
    return %arg0, %c0_i32 : i32, i32
  }
}

</mosaic_0001>

<bundles_post_ra>
// kernel: tpu_custom_call.1
= control target key start
LH: loop header
LB: loop body
LE: loop exit
PB: predicated region body
PF: predicated region fallthrough
CT: control target
= control target key end

     0   :  { %vm25_vm0 = vcmask 261120   ;;  %s522_s0 = inlined_call_operand.vmem [shape: f32[16,32], index: 0, kind: input, shape index: {}]   ;;  %s523_s1 = inlined_call_operand.vmem [shape: f32[32,128], index: 1, kind: input, shape index: {}]   ;;  %s524_s2 = inlined_call_operand.vmem [shape: f32[1,128], index: 2, kind: input, shape index: {}]   ;;  %s525_s3 = inlined_call_operand.vmem [shape: f32[128,32], index: 3, kind: input, shape index: {}]   ;;  %s526_s4 = inlined_call_operand.vmem [shape: f32[1,32], index: 4, kind: input, shape index: {}]   ;;  %s527_s5 = inlined_call_operand.hbm [shape: f32[16,32], index: 5, kind: output, shape index: {}]  }
   0x1   :  { %v30_v0 = vld [vmem:[%s523_s1] sm:$0xff]  ;;  %v31_v1 = vld [vmem:[%s523_s1 + $0x8] sm:$0xff]  ;;  %v32_v2 = vld [vmem:[%s523_s1 + $0x10] sm:$0xff] }
   0x2   :  { %v328_v3 = vpack.c.bf16 %v31_v1, %v30_v0  ;;  %v33_v4 = vld [vmem:[%s523_s1 + $0x18] sm:$0xff]  ;;  %v28_v5 = vld [vmem:[%s522_s0] sm:$0xff]  ;;  %v128_v8 = vld [vmem:[%s525_s3 + $0x8] sm:$0xff] }
   0x3   :  { %v332_v6 = vpack.c.bf16 %v33_v4, %v32_v2  ;;  %290 = vmatprep.mubr.msk.f32.mxu0 %vm25_vm0, %v28_v5  ;;  %v127_v7 = vld [vmem:[%s525_s3] sm:$0xff]  ;;  %v129_v9 = vld [vmem:[%s525_s3 + $0x10] sm:$0xff]  ;;  %v130_v11 = vld [vmem:[%s525_s3 + $0x18] sm:$0xff] }
   0x4   :  { %329 = vmatprep.subr.bf16.mxu0 %v328_v3  ;;  %v336_v10 = vpack.c.bf16 %v128_v8, %v127_v7  ;;  %v340_v12 = vpack.c.bf16 %v130_v11, %v129_v9  ;;  %v131_v13 = vld [vmem:[%s525_s3 + $0x20] sm:$0xff]  ;;  %v132_v14 = vld [vmem:[%s525_s3 + $0x28] sm:$0xff] }
   0x5   :  { %331 = vmatpush3.bf16.msra.mxu0 %v328_v3 }
   0x6   :  { %333 = vmatprep.subr.bf16.mxu0 %v332_v6  ;;  %337 = vmatprep.subr.bf16.mxu1 %v336_v10 }
   0x7   :  { %339 = vmatpush3.bf16.msra.mxu1 %v336_v10 }
   0x8   :  { %10 = vsyncpa [#allocation4], 0  ;;  %341 = vmatprep.subr.bf16.mxu1 %v340_v12  ;;  %v344_v15 = vpack.c.bf16 %v132_v14, %v131_v13  ;;  %v29_v16 = vld [vmem:[%s522_s0 + $0x8] sm:$0xff]  ;;  %v133_v17 = vld [vmem:[%s525_s3 + $0x30] sm:$0xff]  ;;  %v396_v32 = vmov 0.0   ;;  %s397_s11 = smov [#allocation3]  }
   0x9   :  { %335 = vmatpush3.bf16.msra.mxu0 %v332_v6  ;;  %v134_v18 = vld [vmem:[%s525_s3 + $0x38] sm:$0xff]  ;;  %v135_v20 = vld [vmem:[%s525_s3 + $0x40] sm:$0xff]  ;;  %v136_v21 = vld [vmem:[%s525_s3 + $0x48] sm:$0xff]  ;;  %27 = vst.msk [vmem:[#allocation2 + $0x8] sm:$0xff] %vm25_vm0, %v396_v32  ;;  %s243_s12 = sshll.u32 %s397_s11, 4  ;;  %s244_s12 = int_to_ptr.vmem [resolvable:$true] %s243_s12 }
   0xa   :  { %v348_v19 = vpack.c.bf16 %v134_v18, %v133_v17  ;;  %v352_v22 = vpack.c.bf16 %v136_v21, %v135_v20  ;;  %v137_v23 = vld [vmem:[%s525_s3 + $0x50] sm:$0xff]  ;;  %v138_v24 = vld [vmem:[%s525_s3 + $0x58] sm:$0xff]  ;;  %v139_v26 = vld [vmem:[%s525_s3 + $0x60] sm:$0xff]  ;;  %26 = vst.msk [vmem:[#allocation2] sm:$0xff] %vm25_vm0, %v396_v32  ;;  %s372_s13 = scalar_lea.vmem %s244_s12, 256  ;;  %p377_p1 = scmp.lt.s32.totalorder %s244_s12, %s244_s12 }
   0xb   :  { %343 = vmatpush3.bf16.msra.mxu1 %v340_v12  ;;  %v356_v25 = vpack.c.bf16 %v138_v24, %v137_v23  ;;  %v140_v27 = vld [vmem:[%s525_s3 + $0x68] sm:$0xff]  ;;  %v141_v29 = vld [vmem:[%s525_s3 + $0x70] sm:$0xff]  ;;  %v142_v30 = vld [vmem:[%s525_s3 + $0x78] sm:$0xff]  ;;  %p373_p0 = scmp.ne.s32.totalorder %s244_s12, %s372_s13  ;;  %p378_p2 = scmp.lt.s32.totalorder %s372_s13, %s372_s13 }
   0xc   :  { %291 = vmatmul.mubr.msk.f32.vlgmr.msra.gmra.mrb[0].mxu0 %vm25_vm0, %v29_v16  ;;  %345 = vmatprep.subr.bf16.mxu1 %v344_v15  ;;  %v360_v28 = vpack.c.bf16 %v140_v27, %v139_v26  ;;  %v364_v31 = vpack.c.bf16 %v142_v30, %v141_v29  ;;  %v254_v33 = vld [vmem:[%s524_s2] ss:$0 sm:$0xff] }
   0xd   :  { %v257_v46 = vld [vmem:[%s526_s4] ss:$0 sm:$0xff]  ;;  %p379_p3 = por %p378_p2, %p377_p1 }
   0xf   :  { %347 = vmatpush3.bf16.msra.mxu1 %v344_v15  ;;  %p380_p4 = pnand %p379_p3, %p373_p0 }
  0x10   :  { %349 = vmatprep.subr.bf16.mxu1 %v348_v19  ;;  %v126_v40 = vld [vmem:[#allocation2 + $0x8] sm:$0xff] }
  0x11   :  { %v125_v41 = vld [vmem:[#allocation2] sm:$0xff] }
  0x13   :  { %351 = vmatpush3.bf16.msra.mxu1 %v348_v19 }
  0x14   :  { %353 = vmatprep.subr.bf16.mxu1 %v352_v22 }
  0x17   :  { %355 = vmatpush3.bf16.msra.mxu1 %v352_v22 }
  0x18   :  { %357 = vmatprep.subr.bf16.mxu1 %v356_v25 }
  0x1b   :  { %359 = vmatpush3.bf16.msra.mxu1 %v356_v25 }
  0x1c   :  { %361 = vmatprep.subr.bf16.mxu1 %v360_v28 }
  0x1f   :  { %363 = vmatpush3.bf16.msra.mxu1 %v360_v28 }
  0x20   :  { %365 = vmatprep.subr.bf16.mxu1 %v364_v31 }
  0x23   :  { %367 = vmatpush3.bf16.msra.mxu1 %v364_v31 }
  0xdf   :  { %v292_v34 = vpop.f32.mrb[0].mxu0 }
  0xe0   :  { %v120_v35 = vadd.f32 %v292_v34, %v254_v33  ;;  %v114_v36 = vpop.f32.mrb[1].mxu0 }
  0xe1   :  { %v115_v37 = vadd.f32 %v254_v33, %v114_v36 }
  0xe2   :  { %v124_v39 = vmax.f32 %v120_v35, 0.0 }
  0xe3   :  { %v123_v38 = vmax.f32 %v115_v37, 0.0 }
  0xe5   :  { %325 = vmatprep.mubr.f32.mxu1 %v123_v38 }
  0xe6   :  { %326 = vmatmul.mubr.f32.vlgmr.msra.gmra.mrb[0].mxu1 %v124_v39 }
 0x1b9   :  { %v327_v42 = vpop.f32.mrb[0].mxu1 }
 0x1ba   :  { %v219_v43 = vadd.f32 %v327_v42, %v126_v40  ;;  %v209_v44 = vpop.f32.mrb[1].mxu1 }
 0x1bb   :  { %v218_v45 = vadd.f32 %v209_v44, %v125_v41 }
 0x1bc   :  { %221 = vst.msk [vmem:[#allocation2 + $0x8] sm:$0xff] %vm25_vm0, %v219_v43 }
 0x1bd   :  { %220 = vst.msk [vmem:[#allocation2] sm:$0xff] %vm25_vm0, %v218_v45 }
 0x1c3   :  { %v226_v47 = vld [vmem:[#allocation2 + $0x8] sm:$0xff] }
 0x1c4   :  { %v225_v48 = vld [vmem:[#allocation2] sm:$0xff]  ;;  %v235_v49 = vadd.f32 %v257_v46, %v226_v47 }
 0x1c5   :  { %v234_v50 = vadd.f32 %v257_v46, %v225_v48 }
 0x1c6   :  { %237 = vst.msk [vmem:[#allocation3 + $0x8] sm:$0xff] %vm25_vm0, %v235_v49 }
 0x1c7   :  { %236 = vst.msk [vmem:[#allocation3] sm:$0xff] %vm25_vm0, %v234_v50 }
 0x1c8   :  { %383 = shalt.err (!%p380_p4)
}
 0x1c9   :  { %s384_s15 = scalar_lea.hbm %s527_s5, 256 }
 0x1ca   :  { %p385_p5 = scmp.ne.s32.totalorder %s527_s5, %s384_s15  ;;  %p388_p6 = scmp.lt.u32.totalorder %s384_s15, %s527_s5 }
 0x1cc   :  { %p390_p7 = pnand %p388_p6, %p385_p5 }
 0x1ce   :  { %393 = shalt.err (!%p390_p7)
}
 0x1cf   :  { %s398_s20 = smov 128   ;;  %s399_s21 = smov 8  }
 0x1d0   :  { %249 = dma.vmem_to_hbm [thread:$0]  %s244_s12, 256, %s527_s5, [#allocation4], %s398_s20, %s398_s20, %s399_s21  }
 0x1d1   :  { %394 = dma.done.wait [#allocation4], 256  }
 0x1d2   :  { %395 = vsyncadd [#allocation4], 4294967040 }
 0x1d3   :  { %253 = vsyncpa [#allocation4], 1 }

</bundles_post_ra>
